<compile_context>
chip_gen: v7x
topology: tpu7x:2x2x1
jax: 0.10.0
libtpu: 0.0.40
codegen_flags: <defaults>
</compile_context>

<pallas_src>
import functools

import jax
import jax.numpy as jnp
from jax.experimental import pallas as pl
from jax.experimental.pallas import tpu as pltpu

_LANE = 128
_SUBLANE = 8
_K_RESIDENT_MAX = 1024          # keep whole K in one block up to this size


def _round_up(x, m):
    return ((x + m - 1) // m) * m


def _cdiv(a, b):
    return -(-a // b)


@functools.lru_cache(maxsize=1)
def _chip_config():
    """Per-generation tiling knobs, derived from VMEM capacity.

    v7x exposes 64 MiB VMEM per TensorCore (2 TCs/chip); v5e/v6e expose
    128 MiB (1 TC).  Unknown / undetectable chips get the conservative
    (v7x-safe) settings.
    """
    vmem_bytes = 64 * 1024 * 1024  # conservative default if detection fails
    try:
        info = pltpu.get_tpu_info()
        vmem_bytes = int(getattr(info, "vmem_capacity_bytes", vmem_bytes))
    except Exception:
        pass
    if vmem_bytes > 96 * 1024 * 1024:
        # v5e / v6e: 128 MiB VMEM, single TensorCore -> big tiles, no split.
        return dict(vmem_limit=96 * 1024 * 1024,
                    tm_max=2048, tn_max=1024, tk=1024, two_tc=False)
    # v7x (or unknown): 64 MiB VMEM per core, 2 TensorCores.
    return dict(vmem_limit=48 * 1024 * 1024,
                tm_max=1024, tn_max=512, tk=1024, two_tc=True)


def _pick_tm(M, cfg):
    if M <= cfg["tm_max"]:
        if cfg["two_tc"] and M >= 512:
            # Give each v7x TensorCore at least one M block.
            return _round_up(_cdiv(M, 2), 2 * _SUBLANE)
        return M                    # full-dim block: always layout-legal
    return cfg["tm_max"]            # multiple of 8; ragged last block masked


def _pick_tn(N, cfg):
    if N <= cfg["tn_max"]:
        return N                    # full-dim block: always layout-legal
    return cfg["tn_max"]            # multiple of 128; ragged last block masked


def _mm_full_k(a_ref, b_ref, o_ref):
    # Whole contraction dim resident: single MXU pass per output block.
    o_ref[...] = jnp.dot(a_ref[...], b_ref[...],
                         preferred_element_type=jnp.float32)


def _mm_acc_k(a_ref, b_ref, o_ref):
    # K tiled: accumulate directly into the f32, VMEM-resident output block
    # (its index_map ignores k, and k is the innermost "arbitrary" axis).
    @pl.when(pl.program_id(2) == 0)
    def _():
        o_ref[...] = jnp.zeros_like(o_ref)

    o_ref[...] += jnp.dot(a_ref[...], b_ref[...],
                          preferred_element_type=jnp.float32)


@functools.partial(jax.jit, static_argnames=("use_bf16",))
def lat_pred_linear(lat_coord, lat_coef, use_bf16=False):
    """Pallas TPU equivalent of torch.matmul(lat_coord, lat_coef), 2-D operands."""
    lat_coord = jnp.asarray(lat_coord)
    lat_coef = jnp.asarray(lat_coef)
    if lat_coord.ndim != 2 or lat_coef.ndim != 2:
        raise ValueError("lat_pred_linear expects 2-D operands")
    M, K = lat_coord.shape
    K2, N = lat_coef.shape
    if K != K2:
        raise ValueError(f"inner dimensions must match, got {K} vs {K2}")

    in_dtype = jnp.bfloat16 if use_bf16 else jnp.float32
    a = lat_coord.astype(in_dtype)
    b = lat_coef.astype(in_dtype)
    a_isize = jnp.dtype(in_dtype).itemsize
    cfg = _chip_config()

    if K <= _K_RESIDENT_MAX:
        # --- K-resident path: 2-D grid, no K tiling, no padding at all. ----
        tm = _pick_tm(M, cfg)
        tn = _pick_tn(N, cfg)
        gi = _cdiv(M, tm)
        gj = _cdiv(N, tn)

        a_bytes = M * K * a_isize
        b_bytes = K * N * a_isize
        o_bytes = M * N * 4
        # With j innermost, A is streamed once and B re-fetched gi times;
        # with i innermost it is the other way round.  Pick the cheaper order.
        j_inner_traffic = a_bytes + gi * b_bytes
        i_inner_traffic = gj * a_bytes + b_bytes

        if j_inner_traffic <= i_inner_traffic:
            grid = (gi, gj)
            a_spec = pl.BlockSpec((tm, K), lambda i, j: (i, 0))
            b_spec = pl.BlockSpec((K, tn), lambda i, j: (0, j))
            o_spec = pl.BlockSpec((tm, tn), lambda i, j: (i, j))
            bytes_accessed = j_inner_traffic + o_bytes
        else:
            grid = (gj, gi)
            a_spec = pl.BlockSpec((tm, K), lambda j, i: (i, 0))
            b_spec = pl.BlockSpec((K, tn), lambda j, i: (0, j))
            o_spec = pl.BlockSpec((tm, tn), lambda j, i: (i, j))
            bytes_accessed = i_inner_traffic + o_bytes

        kernel = _mm_full_k
        dim_sem = ("parallel", "parallel")
        flops = 2 * M * N * K
    else:
        # --- Large-K path: (i, j, k) grid, accumulate into the output. -----
        tk = cfg["tk"]
        K_pad = _round_up(K, tk)
        if K_pad != K:
            # Only the contraction dim needs explicit zero padding: garbage
            # there would pollute valid outputs, whereas ragged M / N edges
            # only land in masked-off output rows / cols.
            a = jnp.pad(a, ((0, 0), (0, K_pad - K)))
            b = jnp.pad(b, ((0, K_pad - K), (0, 0)))

        tm = _pick_tm(M, cfg)
        tn = _pick_tn(N, cfg)
        gi = _cdiv(M, tm)
        gj = _cdiv(N, tn)
        gk = K_pad // tk

        grid = (gi, gj, gk)
        a_spec = pl.BlockSpec((tm, tk), lambda i, j, k: (i, k))
        b_spec = pl.BlockSpec((tk, tn), lambda i, j, k: (k, j))
        o_spec = pl.BlockSpec((tm, tn), lambda i, j, k: (i, j))

        kernel = _mm_acc_k
        dim_sem = ("parallel", "parallel", "arbitrary")
        flops = 2 * M * N * K_pad
        bytes_accessed = (gj * M * K_pad * a_isize
                          + gi * K_pad * N * a_isize
                          + M * N * 4)

    out = pl.pallas_call(
        kernel,
        out_shape=jax.ShapeDtypeStruct((M, N), jnp.float32),
        grid=grid,
        in_specs=[a_spec, b_spec],
        out_specs=o_spec,
        compiler_params=pltpu.CompilerParams(
            dimension_semantics=dim_sem,
            vmem_limit_bytes=cfg["vmem_limit"],
        ),
        cost_estimate=pl.CostEstimate(
            flops=flops, transcendentals=0, bytes_accessed=bytes_accessed),
    )(a, b)
    return out


if __name__ == "__main__":
    key = jax.random.PRNGKey(0)
    k1, k2, k3, k4, k5, k6 = jax.random.split(key, 6)

    def _rel_err(x, ref):
        return float(jnp.max(jnp.abs(x - ref)) / (jnp.max(jnp.abs(ref)) + 1e-6))

    # 1) Nominal lat_pred shapes: lat_coord [8, 32] @ lat_coef [32, 16].
    #    Single grid step, full-array blocks, no padding, no slicing.
    a1 = jax.random.normal(k1, (8, 32), dtype=jnp.float32)
    b1 = jax.random.normal(k2, (32, 16), dtype=jnp.float32)
    out1 = jax.block_until_ready(lat_pred_linear(a1, b1))
    ref1 = a1 @ b1
    assert out1.shape == ref1.shape and out1.dtype == jnp.float32
    assert jnp.allclose(out1, ref1, atol=1e-4, rtol=1e-4)

    # 2) Large, unaligned M (ragged last M block handled by edge masking,
    #    no wrapper padding/slicing); also exercises the swapped grid order.
    a2 = jax.random.normal(k3, (2104, 256), dtype=jnp.float32)
    b2 = jax.random.normal(k4, (256, 384), dtype=jnp.float32)
    out2 = jax.block_until_ready(lat_pred_linear(a2, b2))
    ref2 = jnp.matmul(a2, b2, precision=jax.lax.Precision.HIGHEST)
    assert out2.shape == (2104, 384)
    assert _rel_err(out2, ref2) < 2e-2

    # 3) Large, unaligned N (ragged last N block).
    a3 = jax.random.normal(k5, (128, 64), dtype=jnp.float32)
    b3 = jax.random.normal(k6, (64, 1200), dtype=jnp.float32)
    out3 = jax.block_until_ready(lat_pred_linear(a3, b3))
    ref3 = jnp.matmul(a3, b3, precision=jax.lax.Precision.HIGHEST)
    assert out3.shape == (128, 1200)
    assert _rel_err(out3, ref3) < 2e-2

    # 4) K > 1024 exercises the accumulating 3-D-grid path (K zero-padded).
    a4 = jax.random.normal(k1, (64, 1536), dtype=jnp.float32)
    b4 = jax.random.normal(k2, (1536, 64), dtype=jnp.float32)
    out4 = jax.block_until_ready(lat_pred_linear(a4, b4))
    ref4 = jnp.matmul(a4, b4, precision=jax.lax.Precision.HIGHEST)
    assert _rel_err(out4, ref4) < 1e-2

    # 5) Opt-in bf16 fast path (f32 accumulate), loose tolerance.
    out5 = jax.block_until_ready(lat_pred_linear(a1, b1, use_bf16=True))
    ref5 = jnp.matmul(a1, b1, precision=jax.lax.Precision.HIGHEST)
    assert out5.dtype == jnp.float32
    assert _rel_err(out5, ref5) < 5e-2

    print("KERNEL_OK")
</pallas_src>

<mosaic_0001>
module attributes {stable_mosaic.version = 11 : i64} {
  func.func @_mm_full_k(%arg0: i32, %arg1: i32, %arg2: memref<8x32xf32, #tpu.memory_space<vmem>>, %arg3: memref<32x16xf32, #tpu.memory_space<vmem>>, %arg4: memref<8x16xf32, #tpu.memory_space<vmem>>) attributes {dimension_semantics = [#tpu.dimension_semantics<parallel>, #tpu.dimension_semantics<parallel>], iteration_bounds = array<i64: 1, 1>, scalar_prefetch = 0 : i64, scratch_operands = 0 : i64, tpu.core_type = #tpu.core_type<tc>, window_params = [{transform_indices = @transform_0, window_bounds = array<i64: 8, 32>}, {transform_indices = @transform_1, window_bounds = array<i64: 32, 16>}, {transform_indices = @transform_2, window_bounds = array<i64: 8, 16>}]} {
    %c0 = arith.constant 0 : index
    %c0_0 = arith.constant 0 : index
    %0 = vector.load %arg2[%c0, %c0_0] : memref<8x32xf32, #tpu.memory_space<vmem>>, vector<8x32xf32>
    %c0_1 = arith.constant 0 : index
    %c0_2 = arith.constant 0 : index
    %1 = vector.load %arg3[%c0_1, %c0_2] : memref<32x16xf32, #tpu.memory_space<vmem>>, vector<32x16xf32>
    %cst = arith.constant dense<0.000000e+00> : vector<8x16xf32>
    %2 = tpu.matmul %0, %1, %cst {dimension_numbers = #tpu.dot_dimension_numbers<[1], [0], [0], [1], [0, 0, 1, 1], [], []>} : vector<8x32xf32>, vector<32x16xf32>, vector<8x16xf32> -> vector<8x16xf32>
    %c0_3 = arith.constant 0 : index
    %c0_4 = arith.constant 0 : index
    %3 = vector.load %arg4[%c0_3, %c0_4] : memref<8x16xf32, #tpu.memory_space<vmem>>, vector<8x16xf32>
    tpu.vector_store %arg4[%c0_3, %c0_4], %2 {strides = array<i32>} : memref<8x16xf32, #tpu.memory_space<vmem>>, vector<8x16xf32>,
    return
  }
  func.func @transform_0(%arg0: i32, %arg1: i32) -> (i32, i32) {
    %c0_i32 = arith.constant 0 : i32
    %c0_i32_0 = arith.constant 0 : i32
    return %arg0, %c0_i32 : i32, i32
  }
  func.func @transform_1(%arg0: i32, %arg1: i32) -> (i32, i32) {
    %c0_i32 = arith.constant 0 : i32
    %c0_i32_0 = arith.constant 0 : i32
    return %c0_i32, %arg1 : i32, i32
  }
  func.func @transform_2(%arg0: i32, %arg1: i32) -> (i32, i32) {
    %c0_i32 = arith.constant 0 : i32
    return %arg0, %arg1 : i32, i32
  }
}

</mosaic_0001>

<bundles_post_ra>
// kernel: lat_pred_linear.1
= control target key start
LH: loop header
LB: loop body
LE: loop exit
PB: predicated region body
PF: predicated region fallthrough
CT: control target
= control target key end

     0   :  { %v158_v3 = vmov 0.0|0.0   ;;  %vm159_vm0 = vmmov 0   ;;  %v160_v6 = vmov 0.0   ;;  %s204_s0 = inlined_call_operand.vmem [shape: f32[8,32], index: 0, kind: input, shape index: {}]   ;;  %s205_s1 = inlined_call_operand.vmem [shape: f32[32,16], index: 1, kind: input, shape index: {}]   ;;  %s206_s2 = inlined_call_operand.hbm [shape: f32[8,16], index: 2, kind: output, shape index: {}]  }
   0x1   :  { %v13_v0 = vld [vmem:[%s205_s1] sm:$0xff]  ;;  %v14_v1 = vld [vmem:[%s205_s1 + $0x8] sm:$0xff]  ;;  %v15_v2 = vld [vmem:[%s205_s1 + $0x10] sm:$0xff]  ;;  %124 = vmatprep.subr.bf16.mxu0 %v158_v3  ;;  %121 = vmatprep.mubr.msk.f32.mxu0 %vm159_vm0, %v160_v6 }
   0x2   :  { %v125_v4 = vpack.c.bf16 %v14_v1, %v13_v0  ;;  %v16_v5 = vld [vmem:[%s205_s1 + $0x18] sm:$0xff] }
   0x3   :  { %7 = vsyncpa [#allocation3], 0  ;;  %v128_v7 = vpack.c.bf16 %v16_v5, %v15_v2  ;;  %v12_v8 = vld [vmem:[%s204_s0] sm:$0xff]  ;;  %vm17_vm1 = vcmask 261120   ;;  %s161_s19 = smov [#allocation2]   ;;  %vm91_vm2 = vcmask 130048  }
   0x4   :  { %126 = vmatpush3.bf16.msra.mxu0 %v125_v4  ;;  %s99_s20 = sshll.u32 %s161_s19, 4  ;;  %s100_s20 = int_to_ptr.vmem [resolvable:$true] %s99_s20 }
   0x5   :  { %127 = vmatprep.subr.bf16.mxu0 %v158_v3  ;;  %s134_s1 = scalar_lea.vmem %s100_s20, 128  ;;  %p139_p1 = scmp.lt.s32.totalorder %s100_s20, %s100_s20 }
   0x6   :  { %p135_p0 = scmp.ne.s32.totalorder %s100_s20, %s134_s1  ;;  %p140_p2 = scmp.lt.s32.totalorder %s134_s1, %s134_s1 }
   0x8   :  { %129 = vmatpush3.bf16.msra.mxu0 %v128_v7  ;;  %p141_p3 = por %p140_p2, %p139_p1 }
   0xa   :  { %p142_p4 = pnand %p141_p3, %p135_p0 }
   0xb   :  { %122 = vmatmul.mubr.msk.f32.vlgmr.msra.gmra.mrb[0].mxu0 %vm17_vm1, %v12_v8 }
  0xde   :  { %v87_v9 = vpop.f32.mrb[0].mxu0 }
  0xdf   :  { %92 = vst.msk [vmem:[#allocation2] sm:$0xff] %vm91_vm2, %v87_v9  ;;  %v123_v10 = vpop.f32.mrb[1].mxu0 }
  0xe0   :  { %145 = shalt.err (!%p142_p4)
}
  0xe1   :  { %s146_s0 = scalar_lea.hbm %s206_s2, 128 }
  0xe2   :  { %p147_p5 = scmp.ne.s32.totalorder %s206_s2, %s146_s0  ;;  %p150_p6 = scmp.lt.u32.totalorder %s146_s0, %s206_s2 }
  0xe4   :  { %p152_p7 = pnand %p150_p6, %p147_p5 }
  0xe6   :  { %155 = shalt.err (!%p152_p7)
}
  0xe7   :  { %102 = dma.vmem_to_hbm [thread:$0]  %s100_s20, 128, %s206_s2, [#allocation3]  }
  0xe8   :  { %156 = dma.done.wait [#allocation3], 128  }
  0xe9   :  { %157 = vsyncadd [#allocation3], 4294967168 }
  0xea   :  { %106 = vsyncpa [#allocation3], 1 }

</bundles_post_ra>
